<compile_context>
chip_gen: v5e
topology: v5e:2x2
jax: 0.10.0
libtpu: 0.0.40
codegen_flags: <defaults>
</compile_context>

<pallas_src>
import jax
import jax.numpy as jnp
from jax import lax
from jax.experimental import pallas as pl
from jax.experimental.pallas import tpu as pltpu


def dqn_train_step_kernel(
        gamma_ref,                      # SMEM (1, 1) scalar
        obs_ref, nobs_ref,              # (Bt, D) streamed
        rew_ref, done_ref, act_ref,     # (Bt, 1) streamed (act is int32)
        w1_ref, w2_ref, w3_ref,         # online net weights, resident
        tw1_ref, tw2_ref, tw3_ref,      # target net weights, resident
        b1_ref, b2_ref, b3_ref,         # online net biases, resident
        tb1_ref, tb2_ref, tb3_ref,      # target net biases, resident
        old_val_ref, loss_ref):
    """One batch tile: both MLP forwards + TD target + partial MSE sum."""
    gamma = gamma_ref[0, 0]

    def q_mlp(x, w1, w2, w3, b1, b2, b3):
        h = jnp.dot(x, w1[...], preferred_element_type=jnp.float32) + b1[...]
        h = jnp.maximum(h, 0.0)
        h = jnp.dot(h, w2[...], preferred_element_type=jnp.float32) + b2[...]
        h = jnp.maximum(h, 0.0)
        return jnp.dot(h, w3[...], preferred_element_type=jnp.float32) + b3[...]

    # ---- target branch (torch.no_grad block) ----
    q_next = q_mlp(nobs_ref[...], tw1_ref, tw2_ref, tw3_ref,
                   tb1_ref, tb2_ref, tb3_ref)                       # (Bt, A)
    target_max = jnp.max(q_next, axis=1, keepdims=True)             # (Bt, 1)
    td_target = rew_ref[...] + gamma * target_max * (1.0 - done_ref[...])

    # ---- online branch: Q(obs).gather(1, actions) via an iota mask ----
    q = q_mlp(obs_ref[...], w1_ref, w2_ref, w3_ref,
              b1_ref, b2_ref, b3_ref)                               # (Bt, A)
    lane = lax.broadcasted_iota(jnp.int32, q.shape, 1)              # (Bt, A)
    old_val = jnp.sum(jnp.where(lane == act_ref[...], q, 0.0),
                      axis=1, keepdims=True)                        # (Bt, 1)
    old_val_ref[...] = old_val

    # ---- per-tile partial of sum((td - old)^2); mean finished in wrapper ----
    diff = td_target - old_val
    loss_ref[0] = jnp.sum(diff * diff, axis=0, keepdims=True)       # (1, 1)


def _pick_block(batch, obs_dim):
    """Rows per grid step.

    Targets ~2 MiB of streamed obs+next_obs per step (amortises the ~0.35 us
    per-step pipeline overhead), keeps >= 2 tiles for large batches so v7x's
    two TensorCores both get work, and falls back to a single full-batch tile
    for small or oddly sized batches.  Multi-tile sizes are multiples of 8 so
    every streamed block satisfies the (8, 128) layout rules (no block puts
    the batch axis on the lane dim).
    """
    row_bytes = 2 * obs_dim * 4                         # obs + next_obs, f32
    target = max(256, (2 * 1024 * 1024) // row_bytes)   # ~2 MiB / grid step
    if batch >= 512 and batch % 16 == 0:
        target = min(target, batch // 2)                # >= 2 tiles on big batches
    if batch <= target:
        return batch
    best = batch
    for bt in range(8, target + 1, 8):                  # largest mult-of-8 divisor
        if batch % bt == 0:
            best = bt
    return best if best <= target else batch


def dqn_train_step(obs, next_obs, actions, rewards, dones, params, tparams,
                   gamma=0.99):
    """obs/next_obs: (B, D); actions/rewards/dones: (B,) or (B, 1).
    params/tparams: dicts with w1 (D,H), b1 (1,H), w2 (H,H), b2 (1,H),
    w3 (H,A), b3 (1,A)."""
    obs = obs.astype(jnp.float32)
    next_obs = next_obs.astype(jnp.float32)
    B, D = obs.shape
    H = params["w1"].shape[1]
    A = params["w3"].shape[1]

    Bt = _pick_block(B, D)
    num_tiles = B // Bt

    # Only tiny per-call ops remain (no weight repacking, no obs stacking).
    rew = rewards.reshape(B, 1).astype(jnp.float32)
    done = dones.reshape(B, 1).astype(jnp.float32)
    act = actions.reshape(B, 1).astype(jnp.int32)
    gamma_arr = jnp.full((1, 1), gamma, jnp.float32)    # SMEM scalar, no recompile per gamma

    mlp_macs = D * H + H * H + H * A
    flops = 4 * B * mlp_macs                            # 2 nets x 2 flops/MAC
    bytes_accessed = 4 * (2 * B * D + 3 * B             # streamed inputs
                          + 2 * mlp_macs + 2 * (2 * H + A)   # weights + biases
                          + B + num_tiles)              # outputs

    def stream(shape):
        return pl.BlockSpec(shape, lambda i: (i, 0))

    def run(single_buffer_weights):
        res_kwargs = {}
        if single_buffer_weights:
            # Weights/biases never change across grid steps -> 1 VMEM buffer.
            res_kwargs = {"pipeline_mode": pl.Buffered(1)}

        def resident(shape):
            return pl.BlockSpec(shape, lambda i: (0,) * len(shape), **res_kwargs)

        return pl.pallas_call(
            dqn_train_step_kernel,
            out_shape=(jax.ShapeDtypeStruct((B, 1), jnp.float32),
                       jax.ShapeDtypeStruct((num_tiles, 1, 1), jnp.float32)),
            grid=(num_tiles,),
            in_specs=[
                pl.BlockSpec((1, 1), lambda i: (0, 0),
                             memory_space=pltpu.MemorySpace.SMEM),      # gamma
                stream((Bt, D)),                                        # obs
                stream((Bt, D)),                                        # next_obs
                stream((Bt, 1)),                                        # rewards
                stream((Bt, 1)),                                        # dones
                stream((Bt, 1)),                                        # actions (int32)
                resident((D, H)), resident((H, H)), resident((H, A)),   # online W
                resident((D, H)), resident((H, H)), resident((H, A)),   # target W
                resident((1, H)), resident((1, H)), resident((1, A)),   # online b
                resident((1, H)), resident((1, H)), resident((1, A)),   # target b
            ],
            out_specs=(
                pl.BlockSpec((Bt, 1), lambda i: (i, 0)),        # old_val per tile
                pl.BlockSpec((1, 1, 1), lambda i: (i, 0, 0)),   # partial loss per tile
            ),
            compiler_params=pltpu.CompilerParams(
                dimension_semantics=("parallel",),
                vmem_limit_bytes=48 * 1024 * 1024),
            cost_estimate=pl.CostEstimate(flops=flops, transcendentals=0,
                                          bytes_accessed=bytes_accessed),
        )(gamma_arr, obs, next_obs, rew, done, act,
          params["w1"], params["w2"], params["w3"],
          tparams["w1"], tparams["w2"], tparams["w3"],
          params["b1"], params["b2"], params["b3"],
          tparams["b1"], tparams["b2"], tparams["b3"])

    try:
        old_val, loss_part = run(single_buffer_weights=True)
    except Exception:
        # pl.Buffered(1) single-buffering not supported on this jax version:
        # fall back to default double-buffered resident weights.
        old_val, loss_part = run(single_buffer_weights=False)

    loss = jnp.sum(loss_part) / jnp.float32(B)
    return old_val.reshape(B), loss


def _init_mlp(key, d_in, d_hidden, d_out):
    ks = jax.random.split(key, 3)
    scale = 0.1
    return {
        "w1": scale * jax.random.normal(ks[0], (d_in, d_hidden), jnp.float32),
        "b1": jnp.zeros((1, d_hidden), jnp.float32),
        "w2": scale * jax.random.normal(ks[1], (d_hidden, d_hidden), jnp.float32),
        "b2": jnp.zeros((1, d_hidden), jnp.float32),
        "w3": scale * jax.random.normal(ks[2], (d_hidden, d_out), jnp.float32),
        "b3": jnp.zeros((1, d_out), jnp.float32),
    }


def _reference(obs, next_obs, actions, rewards, dones, p, tp, gamma):
    def mlp(x, q):
        h = jnp.maximum(x @ q["w1"] + q["b1"], 0.0)
        h = jnp.maximum(h @ q["w2"] + q["b2"], 0.0)
        return h @ q["w3"] + q["b3"]

    tmax = jnp.max(mlp(next_obs, tp), axis=1)
    td = rewards.reshape(-1) + gamma * tmax * (1.0 - dones.reshape(-1))
    q = mlp(obs, p)
    old = jnp.take_along_axis(q, actions.reshape(-1, 1), axis=1).reshape(-1)
    return old, jnp.mean((td - old) ** 2)


if __name__ == "__main__":
    B, D, H, A = 8, 16, 32, 4
    gamma = 0.99

    key = jax.random.PRNGKey(0)
    k_obs, k_nobs, k_act, k_rew, k_done, k_q, k_t = jax.random.split(key, 7)

    obs = jax.random.normal(k_obs, (B, D), jnp.float32)
    next_obs = jax.random.normal(k_nobs, (B, D), jnp.float32)
    actions = jax.random.randint(k_act, (B, 1), 0, A, jnp.int32)
    rewards = jax.random.normal(k_rew, (B, 1), jnp.float32)
    dones = (jax.random.uniform(k_done, (B, 1)) > 0.5).astype(jnp.float32)

    params = _init_mlp(k_q, D, H, A)      # online Q-network
    tparams = _init_mlp(k_t, D, H, A)     # target Q-network

    old_val, loss = dqn_train_step(obs, next_obs, actions, rewards, dones,
                                   params, tparams, gamma)
    jax.block_until_ready((old_val, loss))

    ref_old, ref_loss = _reference(obs, next_obs, actions, rewards, dones,
                                   params, tparams, gamma)
    assert old_val.shape == (B,)
    assert jnp.allclose(old_val, ref_old, atol=2e-2, rtol=2e-2), (old_val, ref_old)
    assert jnp.allclose(loss, ref_loss, atol=2e-2, rtol=2e-2), (loss, ref_loss)

    # TODO(synk): optimizer (Adam), replay buffer and epsilon schedule from the
    # wrapper are host-side bookkeeping, not part of the train_step math kernel.
    print("KERNEL_OK")
</pallas_src>

<mosaic_0001>
module attributes {stable_mosaic.version = 11 : i64} {
  func.func @dqn_train_step_kernel(%arg0: i32, %arg1: memref<1x1xf32, #tpu.memory_space<smem>>, %arg2: memref<8x16xf32, #tpu.memory_space<vmem>>, %arg3: memref<8x16xf32, #tpu.memory_space<vmem>>, %arg4: memref<8x1xf32, #tpu.memory_space<vmem>>, %arg5: memref<8x1xf32, #tpu.memory_space<vmem>>, %arg6: memref<8x1xi32, #tpu.memory_space<vmem>>, %arg7: memref<16x32xf32, #tpu.memory_space<vmem>>, %arg8: memref<32x32xf32, #tpu.memory_space<vmem>>, %arg9: memref<32x4xf32, #tpu.memory_space<vmem>>, %arg10: memref<16x32xf32, #tpu.memory_space<vmem>>, %arg11: memref<32x32xf32, #tpu.memory_space<vmem>>, %arg12: memref<32x4xf32, #tpu.memory_space<vmem>>, %arg13: memref<1x32xf32, #tpu.memory_space<vmem>>, %arg14: memref<1x32xf32, #tpu.memory_space<vmem>>, %arg15: memref<1x4xf32, #tpu.memory_space<vmem>>, %arg16: memref<1x32xf32, #tpu.memory_space<vmem>>, %arg17: memref<1x32xf32, #tpu.memory_space<vmem>>, %arg18: memref<1x4xf32, #tpu.memory_space<vmem>>, %arg19: memref<8x1xf32, #tpu.memory_space<vmem>>, %arg20: memref<1x1x1xf32, #tpu.memory_space<vmem>>) attributes {dimension_semantics = [#tpu.dimension_semantics<parallel>], iteration_bounds = array<i64: 1>, scalar_prefetch = 0 : i64, scratch_operands = 0 : i64, tpu.core_type = #tpu.core_type<tc>, window_params = [{transform_indices = @transform_0, window_bounds = array<i64: 1, 1>}, {transform_indices = @transform_1, window_bounds = array<i64: 8, 16>}, {transform_indices = @transform_2, window_bounds = array<i64: 8, 16>}, {transform_indices = @transform_3, window_bounds = array<i64: 8, 1>}, {transform_indices = @transform_4, window_bounds = array<i64: 8, 1>}, {transform_indices = @transform_5, window_bounds = array<i64: 8, 1>}, {pipeline_mode = #tpu.pipeline_mode<synchronous>, transform_indices = @transform_6, window_bounds = array<i64: 16, 32>}, {pipeline_mode = #tpu.pipeline_mode<synchronous>, transform_indices = @transform_7, window_bounds = array<i64: 32, 32>}, {pipeline_mode = #tpu.pipeline_mode<synchronous>, transform_indices = @transform_8, window_bounds = array<i64: 32, 4>}, {pipeline_mode = #tpu.pipeline_mode<synchronous>, transform_indices = @transform_9, window_bounds = array<i64: 16, 32>}, {pipeline_mode = #tpu.pipeline_mode<synchronous>, transform_indices = @transform_10, window_bounds = array<i64: 32, 32>}, {pipeline_mode = #tpu.pipeline_mode<synchronous>, transform_indices = @transform_11, window_bounds = array<i64: 32, 4>}, {pipeline_mode = #tpu.pipeline_mode<synchronous>, transform_indices = @transform_12, window_bounds = array<i64: 1, 32>}, {pipeline_mode = #tpu.pipeline_mode<synchronous>, transform_indices = @transform_13, window_bounds = array<i64: 1, 32>}, {pipeline_mode = #tpu.pipeline_mode<synchronous>, transform_indices = @transform_14, window_bounds = array<i64: 1, 4>}, {pipeline_mode = #tpu.pipeline_mode<synchronous>, transform_indices = @transform_15, window_bounds = array<i64: 1, 32>}, {pipeline_mode = #tpu.pipeline_mode<synchronous>, transform_indices = @transform_16, window_bounds = array<i64: 1, 32>}, {pipeline_mode = #tpu.pipeline_mode<synchronous>, transform_indices = @transform_17, window_bounds = array<i64: 1, 4>}, {transform_indices = @transform_18, window_bounds = array<i64: 8, 1>}, {transform_indices = @transform_19, window_bounds = array<i64: 1, 1, 1>}]} {
    %c0 = arith.constant 0 : index
    %c0_0 = arith.constant 0 : index
    %0 = memref.load %arg1[%c0, %c0_0] : memref<1x1xf32, #tpu.memory_space<smem>>
    %c0_1 = arith.constant 0 : index
    %c0_2 = arith.constant 0 : index
    %1 = vector.load %arg3[%c0_1, %c0_2] : memref<8x16xf32, #tpu.memory_space<vmem>>, vector<8x16xf32>
    %c0_3 = arith.constant 0 : index
    %c0_4 = arith.constant 0 : index
    %2 = vector.load %arg10[%c0_3, %c0_4] : memref<16x32xf32, #tpu.memory_space<vmem>>, vector<16x32xf32>
    %cst = arith.constant dense<0.000000e+00> : vector<8x32xf32>
    %3 = tpu.matmul %1, %2, %cst {dimension_numbers = #tpu.dot_dimension_numbers<[1], [0], [0], [1], [0, 0, 1, 1], [], []>} : vector<8x16xf32>, vector<16x32xf32>, vector<8x32xf32> -> vector<8x32xf32>
    %c0_5 = arith.constant 0 : index
    %c0_6 = arith.constant 0 : index
    %4 = vector.load %arg16[%c0_5, %c0_6] : memref<1x32xf32, #tpu.memory_space<vmem>>, vector<1x32xf32>
    %5 = vector.broadcast %4 : vector<1x32xf32> to vector<8x32xf32>
    %6 = arith.addf %3, %5 : vector<8x32xf32>
    %cst_7 = arith.constant 0.000000e+00 : f32
    %7 = vector.broadcast %cst_7 : f32 to vector<8x32xf32>
    %8 = arith.maximumf %6, %7 : vector<8x32xf32>
    %c0_8 = arith.constant 0 : index
    %c0_9 = arith.constant 0 : index
    %9 = vector.load %arg11[%c0_8, %c0_9] : memref<32x32xf32, #tpu.memory_space<vmem>>, vector<32x32xf32>
    %cst_10 = arith.constant dense<0.000000e+00> : vector<8x32xf32>
    %10 = tpu.matmul %8, %9, %cst_10 {dimension_numbers = #tpu.dot_dimension_numbers<[1], [0], [0], [1], [0, 0, 1, 1], [], []>} : vector<8x32xf32>, vector<32x32xf32>, vector<8x32xf32> -> vector<8x32xf32>
    %c0_11 = arith.constant 0 : index
    %c0_12 = arith.constant 0 : index
    %11 = vector.load %arg17[%c0_11, %c0_12] : memref<1x32xf32, #tpu.memory_space<vmem>>, vector<1x32xf32>
    %12 = vector.broadcast %11 : vector<1x32xf32> to vector<8x32xf32>
    %13 = arith.addf %10, %12 : vector<8x32xf32>
    %cst_13 = arith.constant 0.000000e+00 : f32
    %14 = vector.broadcast %cst_13 : f32 to vector<8x32xf32>
    %15 = arith.maximumf %13, %14 : vector<8x32xf32>
    %c0_14 = arith.constant 0 : index
    %c0_15 = arith.constant 0 : index
    %16 = vector.load %arg12[%c0_14, %c0_15] : memref<32x4xf32, #tpu.memory_space<vmem>>, vector<32x4xf32>
    %cst_16 = arith.constant dense<0.000000e+00> : vector<8x4xf32>
    %17 = tpu.matmul %15, %16, %cst_16 {dimension_numbers = #tpu.dot_dimension_numbers<[1], [0], [0], [1], [0, 0, 1, 1], [], []>} : vector<8x32xf32>, vector<32x4xf32>, vector<8x4xf32> -> vector<8x4xf32>
    %c0_17 = arith.constant 0 : index
    %c0_18 = arith.constant 0 : index
    %18 = vector.load %arg18[%c0_17, %c0_18] : memref<1x4xf32, #tpu.memory_space<vmem>>, vector<1x4xf32>
    %19 = vector.broadcast %18 : vector<1x4xf32> to vector<8x4xf32>
    %20 = arith.addf %17, %19 : vector<8x4xf32>
    %cst_19 = arith.constant dense<0xFF800000> : vector<8xf32>
    %21 = vector.multi_reduction <maximumf>, %20, %cst_19 [1] : vector<8x4xf32> to vector<8xf32>
    %22 = vector.shape_cast %21 : vector<8xf32> to vector<8x1xf32>
    %c0_20 = arith.constant 0 : index
    %c0_21 = arith.constant 0 : index
    %23 = vector.load %arg4[%c0_20, %c0_21] : memref<8x1xf32, #tpu.memory_space<vmem>>, vector<8x1xf32>
    %24 = vector.broadcast %0 : f32 to vector<8x1xf32>
    %25 = arith.mulf %24, %22 : vector<8x1xf32>
    %c0_22 = arith.constant 0 : index
    %c0_23 = arith.constant 0 : index
    %26 = vector.load %arg5[%c0_22, %c0_23] : memref<8x1xf32, #tpu.memory_space<vmem>>, vector<8x1xf32>
    %cst_24 = arith.constant 1.000000e+00 : f32
    %27 = vector.broadcast %cst_24 : f32 to vector<8x1xf32>
    %28 = arith.subf %27, %26 : vector<8x1xf32>
    %29 = arith.mulf %25, %28 : vector<8x1xf32>
    %30 = arith.addf %23, %29 : vector<8x1xf32>
    %c0_25 = arith.constant 0 : index
    %c0_26 = arith.constant 0 : index
    %31 = vector.load %arg2[%c0_25, %c0_26] : memref<8x16xf32, #tpu.memory_space<vmem>>, vector<8x16xf32>
    %c0_27 = arith.constant 0 : index
    %c0_28 = arith.constant 0 : index
    %32 = vector.load %arg7[%c0_27, %c0_28] : memref<16x32xf32, #tpu.memory_space<vmem>>, vector<16x32xf32>
    %cst_29 = arith.constant dense<0.000000e+00> : vector<8x32xf32>
    %33 = tpu.matmul %31, %32, %cst_29 {dimension_numbers = #tpu.dot_dimension_numbers<[1], [0], [0], [1], [0, 0, 1, 1], [], []>} : vector<8x16xf32>, vector<16x32xf32>, vector<8x32xf32> -> vector<8x32xf32>
    %c0_30 = arith.constant 0 : index
    %c0_31 = arith.constant 0 : index
    %34 = vector.load %arg13[%c0_30, %c0_31] : memref<1x32xf32, #tpu.memory_space<vmem>>, vector<1x32xf32>
    %35 = vector.broadcast %34 : vector<1x32xf32> to vector<8x32xf32>
    %36 = arith.addf %33, %35 : vector<8x32xf32>
    %cst_32 = arith.constant 0.000000e+00 : f32
    %37 = vector.broadcast %cst_32 : f32 to vector<8x32xf32>
    %38 = arith.maximumf %36, %37 : vector<8x32xf32>
    %c0_33 = arith.constant 0 : index
    %c0_34 = arith.constant 0 : index
    %39 = vector.load %arg8[%c0_33, %c0_34] : memref<32x32xf32, #tpu.memory_space<vmem>>, vector<32x32xf32>
    %cst_35 = arith.constant dense<0.000000e+00> : vector<8x32xf32>
    %40 = tpu.matmul %38, %39, %cst_35 {dimension_numbers = #tpu.dot_dimension_numbers<[1], [0], [0], [1], [0, 0, 1, 1], [], []>} : vector<8x32xf32>, vector<32x32xf32>, vector<8x32xf32> -> vector<8x32xf32>
    %c0_36 = arith.constant 0 : index
    %c0_37 = arith.constant 0 : index
    %41 = vector.load %arg14[%c0_36, %c0_37] : memref<1x32xf32, #tpu.memory_space<vmem>>, vector<1x32xf32>
    %42 = vector.broadcast %41 : vector<1x32xf32> to vector<8x32xf32>
    %43 = arith.addf %40, %42 : vector<8x32xf32>
    %cst_38 = arith.constant 0.000000e+00 : f32
    %44 = vector.broadcast %cst_38 : f32 to vector<8x32xf32>
    %45 = arith.maximumf %43, %44 : vector<8x32xf32>
    %c0_39 = arith.constant 0 : index
    %c0_40 = arith.constant 0 : index
    %46 = vector.load %arg9[%c0_39, %c0_40] : memref<32x4xf32, #tpu.memory_space<vmem>>, vector<32x4xf32>
    %cst_41 = arith.constant dense<0.000000e+00> : vector<8x4xf32>
    %47 = tpu.matmul %45, %46, %cst_41 {dimension_numbers = #tpu.dot_dimension_numbers<[1], [0], [0], [1], [0, 0, 1, 1], [], []>} : vector<8x32xf32>, vector<32x4xf32>, vector<8x4xf32> -> vector<8x4xf32>
    %c0_42 = arith.constant 0 : index
    %c0_43 = arith.constant 0 : index
    %48 = vector.load %arg15[%c0_42, %c0_43] : memref<1x4xf32, #tpu.memory_space<vmem>>, vector<1x4xf32>
    %49 = vector.broadcast %48 : vector<1x4xf32> to vector<8x4xf32>
    %50 = arith.addf %47, %49 : vector<8x4xf32>
    %51 = tpu.iota {dimensions = array<i32: 1>} : vector<8x4xi32>
    %c0_44 = arith.constant 0 : index
    %c0_45 = arith.constant 0 : index
    %52 = vector.load %arg6[%c0_44, %c0_45] : memref<8x1xi32, #tpu.memory_space<vmem>>, vector<8x1xi32>
    %53 = vector.broadcast %52 : vector<8x1xi32> to vector<8x4xi32>
    %54 = arith.cmpi eq, %51, %53 : vector<8x4xi32>
    %cst_46 = arith.constant 0.000000e+00 : f32
    %55 = vector.broadcast %cst_46 : f32 to vector<8x4xf32>
    %56 = arith.select %54, %50, %55 : vector<8x4xi1>, vector<8x4xf32>
    %cst_47 = arith.constant dense<0.000000e+00> : vector<8xf32>
    %57 = vector.multi_reduction <add>, %56, %cst_47 [1] : vector<8x4xf32> to vector<8xf32>
    %58 = vector.shape_cast %57 : vector<8xf32> to vector<8x1xf32>
    %c0_48 = arith.constant 0 : index
    %c0_49 = arith.constant 0 : index
    %59 = vector.load %arg19[%c0_48, %c0_49] : memref<8x1xf32, #tpu.memory_space<vmem>>, vector<8x1xf32>
    tpu.vector_store %arg19[%c0_48, %c0_49], %58 {strides = array<i32>} : memref<8x1xf32, #tpu.memory_space<vmem>>, vector<8x1xf32>,
    %60 = arith.subf %30, %58 : vector<8x1xf32>
    %61 = arith.mulf %60, %60 : vector<8x1xf32>
    %cst_50 = arith.constant dense<0.000000e+00> : vector<1xf32>
    %62 = vector.multi_reduction <add>, %61, %cst_50 [0] : vector<8x1xf32> to vector<1xf32>
    %63 = vector.shape_cast %62 : vector<1xf32> to vector<1x1xf32>
    %c0_51 = arith.constant 0 : index
    %c0_52 = arith.constant 0 : index
    %c0_53 = arith.constant 0 : index
    %64 = vector.load %arg20[%c0_51, %c0_52, %c0_53] : memref<1x1x1xf32, #tpu.memory_space<vmem>>, vector<1x1x1xf32>
    %65 = vector.shape_cast %64 : vector<1x1x1xf32> to vector<1x1xf32>
    %66 = vector.shape_cast %63 : vector<1x1xf32> to vector<1x1x1xf32>
    tpu.vector_store %arg20[%c0_51, %c0_52, %c0_53], %66 {strides = array<i32>} : memref<1x1x1xf32, #tpu.memory_space<vmem>>, vector<1x1x1xf32>,
    return
  }
  func.func @transform_0(%arg0: i32) -> (i32, i32) {
    %c0_i32 = arith.constant 0 : i32
    %c0_i32_0 = arith.constant 0 : i32
    %c0_i32_1 = arith.constant 0 : i32
    return %c0_i32, %c0_i32_0 : i32, i32
  }
  func.func @transform_1(%arg0: i32) -> (i32, i32) {
    %c0_i32 = arith.constant 0 : i32
    %c0_i32_0 = arith.constant 0 : i32
    return %arg0, %c0_i32 : i32, i32
  }
  func.func @transform_2(%arg0: i32) -> (i32, i32) {
    %c0_i32 = arith.constant 0 : i32
    %c0_i32_0 = arith.constant 0 : i32
    return %arg0, %c0_i32 : i32, i32
  }
  func.func @transform_3(%arg0: i32) -> (i32, i32) {
    %c0_i32 = arith.constant 0 : i32
    %c0_i32_0 = arith.constant 0 : i32
    return %arg0, %c0_i32 : i32, i32
  }
  func.func @transform_4(%arg0: i32) -> (i32, i32) {
    %c0_i32 = arith.constant 0 : i32
    %c0_i32_0 = arith.constant 0 : i32
    return %arg0, %c0_i32 : i32, i32
  }
  func.func @transform_5(%arg0: i32) -> (i32, i32) {
    %c0_i32 = arith.constant 0 : i32
    %c0_i32_0 = arith.constant 0 : i32
    return %arg0, %c0_i32 : i32, i32
  }
  func.func @transform_6(%arg0: i32) -> (i32, i32) {
    %c0_i32 = arith.constant 0 : i32
    %c0_i32_0 = arith.constant 0 : i32
    %c0_i32_1 = arith.constant 0 : i32
    return %c0_i32, %c0_i32_0 : i32, i32
  }
  func.func @transform_7(%arg0: i32) -> (i32, i32) {
    %c0_i32 = arith.constant 0 : i32
    %c0_i32_0 = arith.constant 0 : i32
    %c0_i32_1 = arith.constant 0 : i32
    return %c0_i32, %c0_i32_0 : i32, i32
  }
  func.func @transform_8(%arg0: i32) -> (i32, i32) {
    %c0_i32 = arith.constant 0 : i32
    %c0_i32_0 = arith.constant 0 : i32
    %c0_i32_1 = arith.constant 0 : i32
    return %c0_i32, %c0_i32_0 : i32, i32
  }
  func.func @transform_9(%arg0: i32) -> (i32, i32) {
    %c0_i32 = arith.constant 0 : i32
    %c0_i32_0 = arith.constant 0 : i32
    %c0_i32_1 = arith.constant 0 : i32
    return %c0_i32, %c0_i32_0 : i32, i32
  }
  func.func @transform_10(%arg0: i32) -> (i32, i32) {
    %c0_i32 = arith.constant 0 : i32
    %c0_i32_0 = arith.constant 0 : i32
    %c0_i32_1 = arith.constant 0 : i32
    return %c0_i32, %c0_i32_0 : i32, i32
  }
  func.func @transform_11(%arg0: i32) -> (i32, i32) {
    %c0_i32 = arith.constant 0 : i32
    %c0_i32_0 = arith.constant 0 : i32
    %c0_i32_1 = arith.constant 0 : i32
    return %c0_i32, %c0_i32_0 : i32, i32
  }
  func.func @transform_12(%arg0: i32) -> (i32, i32) {
    %c0_i32 = arith.constant 0 : i32
    %c0_i32_0 = arith.constant 0 : i32
    %c0_i32_1 = arith.constant 0 : i32
    return %c0_i32, %c0_i32_0 : i32, i32
  }
  func.func @transform_13(%arg0: i32) -> (i32, i32) {
    %c0_i32 = arith.constant 0 : i32
    %c0_i32_0 = arith.constant 0 : i32
    %c0_i32_1 = arith.constant 0 : i32
    return %c0_i32, %c0_i32_0 : i32, i32
  }
  func.func @transform_14(%arg0: i32) -> (i32, i32) {
    %c0_i32 = arith.constant 0 : i32
    %c0_i32_0 = arith.constant 0 : i32
    %c0_i32_1 = arith.constant 0 : i32
    return %c0_i32, %c0_i32_0 : i32, i32
  }
  func.func @transform_15(%arg0: i32) -> (i32, i32) {
    %c0_i32 = arith.constant 0 : i32
    %c0_i32_0 = arith.constant 0 : i32
    %c0_i32_1 = arith.constant 0 : i32
    return %c0_i32, %c0_i32_0 : i32, i32
  }
  func.func @transform_16(%arg0: i32) -> (i32, i32) {
    %c0_i32 = arith.constant 0 : i32
    %c0_i32_0 = arith.constant 0 : i32
    %c0_i32_1 = arith.constant 0 : i32
    return %c0_i32, %c0_i32_0 : i32, i32
  }
  func.func @transform_17(%arg0: i32) -> (i32, i32) {
    %c0_i32 = arith.constant 0 : i32
    %c0_i32_0 = arith.constant 0 : i32
    %c0_i32_1 = arith.constant 0 : i32
    return %c0_i32, %c0_i32_0 : i32, i32
  }
  func.func @transform_18(%arg0: i32) -> (i32, i32) {
    %c0_i32 = arith.constant 0 : i32
    %c0_i32_0 = arith.constant 0 : i32
    return %arg0, %c0_i32 : i32, i32
  }
  func.func @transform_19(%arg0: i32) -> (i32, i32, i32) {
    %c0_i32 = arith.constant 0 : i32
    %c0_i32_0 = arith.constant 0 : i32
    %c0_i32_1 = arith.constant 0 : i32
    return %arg0, %c0_i32, %c0_i32_0 : i32, i32, i32
  }
}

module attributes {stable_mosaic.version = 11 : i64} {
  func.func @dqn_train_step_kernel(%arg0: i32, %arg1: memref<1x1xf32, #tpu.memory_space<smem>>, %arg2: memref<8x16xf32, #tpu.memory_space<vmem>>, %arg3: memref<8x16xf32, #tpu.memory_space<vmem>>, %arg4: memref<8x1xf32, #tpu.memory_space<vmem>>, %arg5: memref<8x1xf32, #tpu.memory_space<vmem>>, %arg6: memref<8x1xi32, #tpu.memory_space<vmem>>, %arg7: memref<16x32xf32, #tpu.memory_space<vmem>>, %arg8: memref<32x32xf32, #tpu.memory_space<vmem>>, %arg9: memref<32x4xf32, #tpu.memory_space<vmem>>, %arg10: memref<16x32xf32, #tpu.memory_space<vmem>>, %arg11: memref<32x32xf32, #tpu.memory_space<vmem>>, %arg12: memref<32x4xf32, #tpu.memory_space<vmem>>, %arg13: memref<1x32xf32, #tpu.memory_space<vmem>>, %arg14: memref<1x32xf32, #tpu.memory_space<vmem>>, %arg15: memref<1x4xf32, #tpu.memory_space<vmem>>, %arg16: memref<1x32xf32, #tpu.memory_space<vmem>>, %arg17: memref<1x32xf32, #tpu.memory_space<vmem>>, %arg18: memref<1x4xf32, #tpu.memory_space<vmem>>, %arg19: memref<8x1xf32, #tpu.memory_space<vmem>>, %arg20: memref<1x1x1xf32, #tpu.memory_space<vmem>>) attributes {dimension_semantics = [#tpu.dimension_semantics<parallel>], iteration_bounds = array<i64: 1>, scalar_prefetch = 0 : i64, scratch_operands = 0 : i64, tpu.core_type = #tpu.core_type<tc>, window_params = [{transform_indices = @transform_0, window_bounds = array<i64: 1, 1>}, {transform_indices = @transform_1, window_bounds = array<i64: 8, 16>}, {transform_indices = @transform_2, window_bounds = array<i64: 8, 16>}, {transform_indices = @transform_3, window_bounds = array<i64: 8, 1>}, {transform_indices = @transform_4, window_bounds = array<i64: 8, 1>}, {transform_indices = @transform_5, window_bounds = array<i64: 8, 1>}, {pipeline_mode = #tpu.pipeline_mode<synchronous>, transform_indices = @transform_6, window_bounds = array<i64: 16, 32>}, {pipeline_mode = #tpu.pipeline_mode<synchronous>, transform_indices = @transform_7, window_bounds = array<i64: 32, 32>}, {pipeline_mode = #tpu.pipeline_mode<synchronous>, transform_indices = @transform_8, window_bounds = array<i64: 32, 4>}, {pipeline_mode = #tpu.pipeline_mode<synchronous>, transform_indices = @transform_9, window_bounds = array<i64: 16, 32>}, {pipeline_mode = #tpu.pipeline_mode<synchronous>, transform_indices = @transform_10, window_bounds = array<i64: 32, 32>}, {pipeline_mode = #tpu.pipeline_mode<synchronous>, transform_indices = @transform_11, window_bounds = array<i64: 32, 4>}, {pipeline_mode = #tpu.pipeline_mode<synchronous>, transform_indices = @transform_12, window_bounds = array<i64: 1, 32>}, {pipeline_mode = #tpu.pipeline_mode<synchronous>, transform_indices = @transform_13, window_bounds = array<i64: 1, 32>}, {pipeline_mode = #tpu.pipeline_mode<synchronous>, transform_indices = @transform_14, window_bounds = array<i64: 1, 4>}, {pipeline_mode = #tpu.pipeline_mode<synchronous>, transform_indices = @transform_15, window_bounds = array<i64: 1, 32>}, {pipeline_mode = #tpu.pipeline_mode<synchronous>, transform_indices = @transform_16, window_bounds = array<i64: 1, 32>}, {pipeline_mode = #tpu.pipeline_mode<synchronous>, transform_indices = @transform_17, window_bounds = array<i64: 1, 4>}, {transform_indices = @transform_18, window_bounds = array<i64: 8, 1>}, {transform_indices = @transform_19, window_bounds = array<i64: 1, 1, 1>}]} {
    %c0 = arith.constant 0 : index
    %c0_0 = arith.constant 0 : index
    %0 = memref.load %arg1[%c0, %c0_0] : memref<1x1xf32, #tpu.memory_space<smem>>
    %c0_1 = arith.constant 0 : index
    %c0_2 = arith.constant 0 : index
    %1 = vector.load %arg3[%c0_1, %c0_2] : memref<8x16xf32, #tpu.memory_space<vmem>>, vector<8x16xf32>
    %c0_3 = arith.constant 0 : index
    %c0_4 = arith.constant 0 : index
    %2 = vector.load %arg10[%c0_3, %c0_4] : memref<16x32xf32, #tpu.memory_space<vmem>>, vector<16x32xf32>
    %cst = arith.constant dense<0.000000e+00> : vector<8x32xf32>
    %3 = tpu.matmul %1, %2, %cst {dimension_numbers = #tpu.dot_dimension_numbers<[1], [0], [0], [1], [0, 0, 1, 1], [], []>} : vector<8x16xf32>, vector<16x32xf32>, vector<8x32xf32> -> vector<8x32xf32>
    %c0_5 = arith.constant 0 : index
    %c0_6 = arith.constant 0 : index
    %4 = vector.load %arg16[%c0_5, %c0_6] : memref<1x32xf32, #tpu.memory_space<vmem>>, vector<1x32xf32>
    %5 = vector.broadcast %4 : vector<1x32xf32> to vector<8x32xf32>
    %6 = arith.addf %3, %5 : vector<8x32xf32>
    %cst_7 = arith.constant 0.000000e+00 : f32
    %7 = vector.broadcast %cst_7 : f32 to vector<8x32xf32>
    %8 = arith.maximumf %6, %7 : vector<8x32xf32>
    %c0_8 = arith.constant 0 : index
    %c0_9 = arith.constant 0 : index
    %9 = vector.load %arg11[%c0_8, %c0_9] : memref<32x32xf32, #tpu.memory_space<vmem>>, vector<32x32xf32>
    %cst_10 = arith.constant dense<0.000000e+00> : vector<8x32xf32>
    %10 = tpu.matmul %8, %9, %cst_10 {dimension_numbers = #tpu.dot_dimension_numbers<[1], [0], [0], [1], [0, 0, 1, 1], [], []>} : vector<8x32xf32>, vector<32x32xf32>, vector<8x32xf32> -> vector<8x32xf32>
    %c0_11 = arith.constant 0 : index
    %c0_12 = arith.constant 0 : index
    %11 = vector.load %arg17[%c0_11, %c0_12] : memref<1x32xf32, #tpu.memory_space<vmem>>, vector<1x32xf32>
    %12 = vector.broadcast %11 : vector<1x32xf32> to vector<8x32xf32>
    %13 = arith.addf %10, %12 : vector<8x32xf32>
    %cst_13 = arith.constant 0.000000e+00 : f32
    %14 = vector.broadcast %cst_13 : f32 to vector<8x32xf32>
    %15 = arith.maximumf %13, %14 : vector<8x32xf32>
    %c0_14 = arith.constant 0 : index
    %c0_15 = arith.constant 0 : index
    %16 = vector.load %arg12[%c0_14, %c0_15] : memref<32x4xf32, #tpu.memory_space<vmem>>, vector<32x4xf32>
    %cst_16 = arith.constant dense<0.000000e+00> : vector<8x4xf32>
    %17 = tpu.matmul %15, %16, %cst_16 {dimension_numbers = #tpu.dot_dimension_numbers<[1], [0], [0], [1], [0, 0, 1, 1], [], []>} : vector<8x32xf32>, vector<32x4xf32>, vector<8x4xf32> -> vector<8x4xf32>
    %c0_17 = arith.constant 0 : index
    %c0_18 = arith.constant 0 : index
    %18 = vector.load %arg18[%c0_17, %c0_18] : memref<1x4xf32, #tpu.memory_space<vmem>>, vector<1x4xf32>
    %19 = vector.broadcast %18 : vector<1x4xf32> to vector<8x4xf32>
    %20 = arith.addf %17, %19 : vector<8x4xf32>
    %cst_19 = arith.constant dense<0xFF800000> : vector<8xf32>
    %21 = vector.multi_reduction <maximumf>, %20, %cst_19 [1] : vector<8x4xf32> to vector<8xf32>
    %22 = vector.shape_cast %21 : vector<8xf32> to vector<8x1xf32>
    %c0_20 = arith.constant 0 : index
    %c0_21 = arith.constant 0 : index
    %23 = vector.load %arg4[%c0_20, %c0_21] : memref<8x1xf32, #tpu.memory_space<vmem>>, vector<8x1xf32>
    %24 = vector.broadcast %0 : f32 to vector<8x1xf32>
    %25 = arith.mulf %24, %22 : vector<8x1xf32>
    %c0_22 = arith.constant 0 : index
    %c0_23 = arith.constant 0 : index
    %26 = vector.load %arg5[%c0_22, %c0_23] : memref<8x1xf32, #tpu.memory_space<vmem>>, vector<8x1xf32>
    %cst_24 = arith.constant 1.000000e+00 : f32
    %27 = vector.broadcast %cst_24 : f32 to vector<8x1xf32>
    %28 = arith.subf %27, %26 : vector<8x1xf32>
    %29 = arith.mulf %25, %28 : vector<8x1xf32>
    %30 = arith.addf %23, %29 : vector<8x1xf32>
    %c0_25 = arith.constant 0 : index
    %c0_26 = arith.constant 0 : index
    %31 = vector.load %arg2[%c0_25, %c0_26] : memref<8x16xf32, #tpu.memory_space<vmem>>, vector<8x16xf32>
    %c0_27 = arith.constant 0 : index
    %c0_28 = arith.constant 0 : index
    %32 = vector.load %arg7[%c0_27, %c0_28] : memref<16x32xf32, #tpu.memory_space<vmem>>, vector<16x32xf32>
    %cst_29 = arith.constant dense<0.000000e+00> : vector<8x32xf32>
    %33 = tpu.matmul %31, %32, %cst_29 {dimension_numbers = #tpu.dot_dimension_numbers<[1], [0], [0], [1], [0, 0, 1, 1], [], []>} : vector<8x16xf32>, vector<16x32xf32>, vector<8x32xf32> -> vector<8x32xf32>
    %c0_30 = arith.constant 0 : index
    %c0_31 = arith.constant 0 : index
    %34 = vector.load %arg13[%c0_30, %c0_31] : memref<1x32xf32, #tpu.memory_space<vmem>>, vector<1x32xf32>
    %35 = vector.broadcast %34 : vector<1x32xf32> to vector<8x32xf32>
    %36 = arith.addf %33, %35 : vector<8x32xf32>
    %cst_32 = arith.constant 0.000000e+00 : f32
    %37 = vector.broadcast %cst_32 : f32 to vector<8x32xf32>
    %38 = arith.maximumf %36, %37 : vector<8x32xf32>
    %c0_33 = arith.constant 0 : index
    %c0_34 = arith.constant 0 : index
    %39 = vector.load %arg8[%c0_33, %c0_34] : memref<32x32xf32, #tpu.memory_space<vmem>>, vector<32x32xf32>
    %cst_35 = arith.constant dense<0.000000e+00> : vector<8x32xf32>
    %40 = tpu.matmul %38, %39, %cst_35 {dimension_numbers = #tpu.dot_dimension_numbers<[1], [0], [0], [1], [0, 0, 1, 1], [], []>} : vector<8x32xf32>, vector<32x32xf32>, vector<8x32xf32> -> vector<8x32xf32>
    %c0_36 = arith.constant 0 : index
    %c0_37 = arith.constant 0 : index
    %41 = vector.load %arg14[%c0_36, %c0_37] : memref<1x32xf32, #tpu.memory_space<vmem>>, vector<1x32xf32>
    %42 = vector.broadcast %41 : vector<1x32xf32> to vector<8x32xf32>
    %43 = arith.addf %40, %42 : vector<8x32xf32>
    %cst_38 = arith.constant 0.000000e+00 : f32
    %44 = vector.broadcast %cst_38 : f32 to vector<8x32xf32>
    %45 = arith.maximumf %43, %44 : vector<8x32xf32>
    %c0_39 = arith.constant 0 : index
    %c0_40 = arith.constant 0 : index
    %46 = vector.load %arg9[%c0_39, %c0_40] : memref<32x4xf32, #tpu.memory_space<vmem>>, vector<32x4xf32>
    %cst_41 = arith.constant dense<0.000000e+00> : vector<8x4xf32>
    %47 = tpu.matmul %45, %46, %cst_41 {dimension_numbers = #tpu.dot_dimension_numbers<[1], [0], [0], [1], [0, 0, 1, 1], [], []>} : vector<8x32xf32>, vector<32x4xf32>, vector<8x4xf32> -> vector<8x4xf32>
    %c0_42 = arith.constant 0 : index
    %c0_43 = arith.constant 0 : index
    %48 = vector.load %arg15[%c0_42, %c0_43] : memref<1x4xf32, #tpu.memory_space<vmem>>, vector<1x4xf32>
    %49 = vector.broadcast %48 : vector<1x4xf32> to vector<8x4xf32>
    %50 = arith.addf %47, %49 : vector<8x4xf32>
    %51 = tpu.iota {dimensions = array<i32: 1>} : vector<8x4xi32>
    %c0_44 = arith.constant 0 : index
    %c0_45 = arith.constant 0 : index
    %52 = vector.load %arg6[%c0_44, %c0_45] : memref<8x1xi32, #tpu.memory_space<vmem>>, vector<8x1xi32>
    %53 = vector.broadcast %52 : vector<8x1xi32> to vector<8x4xi32>
    %54 = arith.cmpi eq, %51, %53 : vector<8x4xi32>
    %cst_46 = arith.constant 0.000000e+00 : f32
    %55 = vector.broadcast %cst_46 : f32 to vector<8x4xf32>
    %56 = arith.select %54, %50, %55 : vector<8x4xi1>, vector<8x4xf32>
    %cst_47 = arith.constant dense<0.000000e+00> : vector<8xf32>
    %57 = vector.multi_reduction <add>, %56, %cst_47 [1] : vector<8x4xf32> to vector<8xf32>
    %58 = vector.shape_cast %57 : vector<8xf32> to vector<8x1xf32>
    %c0_48 = arith.constant 0 : index
    %c0_49 = arith.constant 0 : index
    %59 = vector.load %arg19[%c0_48, %c0_49] : memref<8x1xf32, #tpu.memory_space<vmem>>, vector<8x1xf32>
    tpu.vector_store %arg19[%c0_48, %c0_49], %58 {strides = array<i32>} : memref<8x1xf32, #tpu.memory_space<vmem>>, vector<8x1xf32>,
    %60 = arith.subf %30, %58 : vector<8x1xf32>
    %61 = arith.mulf %60, %60 : vector<8x1xf32>
    %cst_50 = arith.constant dense<0.000000e+00> : vector<1xf32>
    %62 = vector.multi_reduction <add>, %61, %cst_50 [0] : vector<8x1xf32> to vector<1xf32>
    %63 = vector.shape_cast %62 : vector<1xf32> to vector<1x1xf32>
    %c0_51 = arith.constant 0 : index
    %c0_52 = arith.constant 0 : index
    %c0_53 = arith.constant 0 : index
    %64 = vector.load %arg20[%c0_51, %c0_52, %c0_53] : memref<1x1x1xf32, #tpu.memory_space<vmem>>, vector<1x1x1xf32>
    %65 = vector.shape_cast %64 : vector<1x1x1xf32> to vector<1x1xf32>
    %66 = vector.shape_cast %63 : vector<1x1xf32> to vector<1x1x1xf32>
    tpu.vector_store %arg20[%c0_51, %c0_52, %c0_53], %66 {strides = array<i32>} : memref<1x1x1xf32, #tpu.memory_space<vmem>>, vector<1x1x1xf32>,
    return
  }
  func.func @transform_0(%arg0: i32) -> (i32, i32) {
    %c0_i32 = arith.constant 0 : i32
    %c0_i32_0 = arith.constant 0 : i32
    %c0_i32_1 = arith.constant 0 : i32
    return %c0_i32, %c0_i32_0 : i32, i32
  }
  func.func @transform_1(%arg0: i32) -> (i32, i32) {
    %c0_i32 = arith.constant 0 : i32
    %c0_i32_0 = arith.constant 0 : i32
    return %arg0, %c0_i32 : i32, i32
  }
  func.func @transform_2(%arg0: i32) -> (i32, i32) {
    %c0_i32 = arith.constant 0 : i32
    %c0_i32_0 = arith.constant 0 : i32
    return %arg0, %c0_i32 : i32, i32
  }
  func.func @transform_3(%arg0: i32) -> (i32, i32) {
    %c0_i32 = arith.constant 0 : i32
    %c0_i32_0 = arith.constant 0 : i32
    return %arg0, %c0_i32 : i32, i32
  }
  func.func @transform_4(%arg0: i32) -> (i32, i32) {
    %c0_i32 = arith.constant 0 : i32
    %c0_i32_0 = arith.constant 0 : i32
    return %arg0, %c0_i32 : i32, i32
  }
  func.func @transform_5(%arg0: i32) -> (i32, i32) {
    %c0_i32 = arith.constant 0 : i32
    %c0_i32_0 = arith.constant 0 : i32
    return %arg0, %c0_i32 : i32, i32
  }
  func.func @transform_6(%arg0: i32) -> (i32, i32) {
    %c0_i32 = arith.constant 0 : i32
    %c0_i32_0 = arith.constant 0 : i32
    %c0_i32_1 = arith.constant 0 : i32
    return %c0_i32, %c0_i32_0 : i32, i32
  }
  func.func @transform_7(%arg0: i32) -> (i32, i32) {
    %c0_i32 = arith.constant 0 : i32
    %c0_i32_0 = arith.constant 0 : i32
    %c0_i32_1 = arith.constant 0 : i32
    return %c0_i32, %c0_i32_0 : i32, i32
  }
  func.func @transform_8(%arg0: i32) -> (i32, i32) {
    %c0_i32 = arith.constant 0 : i32
    %c0_i32_0 = arith.constant 0 : i32
    %c0_i32_1 = arith.constant 0 : i32
    return %c0_i32, %c0_i32_0 : i32, i32
  }
  func.func @transform_9(%arg0: i32) -> (i32, i32) {
    %c0_i32 = arith.constant 0 : i32
    %c0_i32_0 = arith.constant 0 : i32
    %c0_i32_1 = arith.constant 0 : i32
    return %c0_i32, %c0_i32_0 : i32, i32
  }
  func.func @transform_10(%arg0: i32) -> (i32, i32) {
    %c0_i32 = arith.constant 0 : i32
    %c0_i32_0 = arith.constant 0 : i32
    %c0_i32_1 = arith.constant 0 : i32
    return %c0_i32, %c0_i32_0 : i32, i32
  }
  func.func @transform_11(%arg0: i32) -> (i32, i32) {
    %c0_i32 = arith.constant 0 : i32
    %c0_i32_0 = arith.constant 0 : i32
    %c0_i32_1 = arith.constant 0 : i32
    return %c0_i32, %c0_i32_0 : i32, i32
  }
  func.func @transform_12(%arg0: i32) -> (i32, i32) {
    %c0_i32 = arith.constant 0 : i32
    %c0_i32_0 = arith.constant 0 : i32
    %c0_i32_1 = arith.constant 0 : i32
    return %c0_i32, %c0_i32_0 : i32, i32
  }
  func.func @transform_13(%arg0: i32) -> (i32, i32) {
    %c0_i32 = arith.constant 0 : i32
    %c0_i32_0 = arith.constant 0 : i32
    %c0_i32_1 = arith.constant 0 : i32
    return %c0_i32, %c0_i32_0 : i32, i32
  }
  func.func @transform_14(%arg0: i32) -> (i32, i32) {
    %c0_i32 = arith.constant 0 : i32
    %c0_i32_0 = arith.constant 0 : i32
    %c0_i32_1 = arith.constant 0 : i32
    return %c0_i32, %c0_i32_0 : i32, i32
  }
  func.func @transform_15(%arg0: i32) -> (i32, i32) {
    %c0_i32 = arith.constant 0 : i32
    %c0_i32_0 = arith.constant 0 : i32
    %c0_i32_1 = arith.constant 0 : i32
    return %c0_i32, %c0_i32_0 : i32, i32
  }
  func.func @transform_16(%arg0: i32) -> (i32, i32) {
    %c0_i32 = arith.constant 0 : i32
    %c0_i32_0 = arith.constant 0 : i32
    %c0_i32_1 = arith.constant 0 : i32
    return %c0_i32, %c0_i32_0 : i32, i32
  }
  func.func @transform_17(%arg0: i32) -> (i32, i32) {
    %c0_i32 = arith.constant 0 : i32
    %c0_i32_0 = arith.constant 0 : i32
    %c0_i32_1 = arith.constant 0 : i32
    return %c0_i32, %c0_i32_0 : i32, i32
  }
  func.func @transform_18(%arg0: i32) -> (i32, i32) {
    %c0_i32 = arith.constant 0 : i32
    %c0_i32_0 = arith.constant 0 : i32
    return %arg0, %c0_i32 : i32, i32
  }
  func.func @transform_19(%arg0: i32) -> (i32, i32, i32) {
    %c0_i32 = arith.constant 0 : i32
    %c0_i32_0 = arith.constant 0 : i32
    %c0_i32_1 = arith.constant 0 : i32
    return %arg0, %c0_i32, %c0_i32_0 : i32, i32, i32
  }
}

</mosaic_0001>

<bundles_post_ra>
// kernel: tpu_custom_call.1
= control target key start
LH: loop header
LB: loop body
LE: loop exit
PB: predicated region body
PF: predicated region fallthrough
CT: control target
= control target key end

     0   :  { %s644_s0 = inlined_call_operand.<no memory space> [shape: f32[1,1], index: 0, kind: input, shape index: {}]   ;;  %s645_s1 = inlined_call_operand.hbm [shape: f32[8,16], index: 1, kind: input, shape index: {}]   ;;  %s646_s2 = inlined_call_operand.hbm [shape: f32[8,16], index: 2, kind: input, shape index: {}]   ;;  %s647_s3 = inlined_call_operand.vmem [shape: f32[8,1], index: 3, kind: input, shape index: {}]   ;;  %s648_s4 = inlined_call_operand.vmem [shape: f32[8,1], index: 4, kind: input, shape index: {}]   ;;  %s649_s5 = inlined_call_operand.vmem [shape: s32[8,1], index: 5, kind: input, shape index: {}]   ;;  %s650_s6 = inlined_call_operand.vmem [shape: f32[16,32], index: 6, kind: input, shape index: {}]   ;;  %s651_s7 = inlined_call_operand.vmem [shape: f32[32,32], index: 7, kind: input, shape index: {}]   ;;  %s652_s8 = inlined_call_operand.vmem [shape: f32[32,4], index: 8, kind: input, shape index: {}]   ;;  %s653_s9 = inlined_call_operand.vmem [shape: f32[16,32], index: 9, kind: input, shape index: {}]   ;;  %s654_s10 = inlined_call_operand.vmem [shape: f32[32,32], index: 10, kind: input, shape index: {}]   ;;  %s655_s11 = inlined_call_operand.vmem [shape: f32[32,4], index: 11, kind: input, shape index: {}]   ;;  %s656_s12 = inlined_call_operand.vmem [shape: f32[1,32], index: 12, kind: input, shape index: {}]   ;;  %s657_s13 = inlined_call_operand.vmem [shape: f32[1,32], index: 13, kind: input, shape index: {}]   ;;  %s658_s14 = inlined_call_operand.vmem [shape: f32[1,4], index: 14, kind: input, shape index: {}]   ;;  %s659_s15 = inlined_call_operand.vmem [shape: f32[1,32], index: 15, kind: input, shape index: {}]   ;;  %s660_s16 = inlined_call_operand.vmem [shape: f32[1,32], index: 16, kind: input, shape index: {}]   ;;  %s661_s17 = inlined_call_operand.vmem [shape: f32[1,4], index: 17, kind: input, shape index: {}]   ;;  %s662_s18 = inlined_call_operand.vmem [shape: f32[8,1], index: 18, kind: output, shape index: {0}]   ;;  %s663_s19 = inlined_call_operand.hbm [shape: f32[1,1,1], index: 19, kind: output, shape index: {1}]  }
   0x1   :  { %664 = sst [smem:[#allocation12_spill]] %s644_s0 }
   0x2   :  { %665 = sst [smem:[#allocation13_spill]] %s645_s1 }
   0x3   :  { %666 = sst [smem:[#allocation14_spill]] %s646_s2 }
   0x4   :  { %667 = sst [smem:[#allocation15_spill]] %s647_s3 }
   0x5   :  { %26 = vsyncpa [#allocation4], 0 }
   0x6   :  { %27 = vsyncpa [#allocation7], 0 }
   0x7   :  { %28 = vsyncpa [#allocation5], 0  ;;  %s668_s20 = sld [smem:[#allocation13_spill]]  ;;  %s434_s1 = smov [#allocation3]  }
   0x8   :  { %s38_s22 = sshll.u32 %s434_s1, 4  ;;  %s669_s24 = sld [smem:[#allocation14_spill]]  ;;  %s39_s22 = int_to_ptr.vmem [resolvable:$true] %s38_s22 }
   0x9   :  { %s435_s3 = smov [#allocation6]  }
   0xa   :  { %s49_s26 = sshll.u32 %s435_s3, 4  ;;  %s50_s26 = int_to_ptr.vmem [resolvable:$true] %s49_s26 }
   0xd   :  { %s36_s21 = sshll.u32 %s668_s20, 4  ;;  %s37_s21 = int_to_ptr.hbm [resolvable:$true] %s36_s21 }
   0xe   :  { %s47_s25 = sshll.u32 %s669_s24, 4  ;;  %s48_s25 = int_to_ptr.hbm [resolvable:$true] %s47_s25 }
   0xf   :  { %41 = dma.hbm_to_vmem [thread:$0]  %s37_s21, 128, %s39_s22, [#allocation4]  }
  0x10   :  { %52 = dma.hbm_to_vmem [thread:$0]  %s48_s25, 128, %s50_s26, [#allocation7]  }
  0x11   :  { %428 = dma.done.wait [#allocation4], 128  }
  0x12   :  { %429 = vsyncadd [#allocation4], 4294967168 }
  0x13   :  { %430 = dma.done.wait [#allocation7], 128  }
  0x14   :  { %431 = vsyncadd [#allocation7], 4294967168  ;;  %v201_v0 = vld [vmem:[%s650_s6 + $0x8] sm:$0xff]  ;;  %v200_v2 = vld [vmem:[%s650_s6] sm:$0xff]  ;;  %vm99_vm0 = vcmask 130048   ;;  %vm132_vm1 = vcmask 261120   ;;  %v293_v41 = vlaneseq }
  0x15   :  { %v94_v1 = vld [vmem:[%s653_s9 + $0x8] sm:$0xff]  ;;  %223 = vmatpush.msra.mxu3 %v201_v0  ;;  %v93_v3 = vld [vmem:[%s653_s9] sm:$0xff]  ;;  %v127_v6 = vld [vmem:[%s654_s10 + $0x18] sm:$0xff]  ;;  %v436_v31 = vmov 0   ;;  %vm188_vm2 = vcmask 31744   ;;  %s670_s24 = sld [smem:[#allocation12_spill]] }
  0x16   :  { %117 = vmatpush.msra.mxu0 %v94_v1  ;;  %v199_v4 = vld [vmem:[#allocation3] sm:$0xff]  ;;  %v92_v5 = vld [vmem:[#allocation6] sm:$0xff]  ;;  %148 = vmatpush.msra.mxu1 %v127_v6  ;;  %v126_v7 = vld [vmem:[%s654_s10 + $0x10] sm:$0xff]  ;;  %v294_v44 = vand.u32 127, %v293_v41  ;;  %s671_s25 = sld [smem:[#allocation15_spill]]  ;;  %vm304_vm4 = vcmask 7168  }
  0x17   :  { %224 = vmatpush.msra.mxu3 %v200_v2  ;;  %v125_v8 = vld [vmem:[%s654_s10 + $0x8] sm:$0xff]  ;;  %v233_v9 = vld [vmem:[%s651_s7 + $0x18] sm:$0xff]  ;;  %v124_v10 = vld [vmem:[%s654_s10] sm:$0xff]  ;;  %349 = vset.pattern.permute.xlu0 %v436_v31  ;;  %s326_s28 = sshll.u32 %s663_s19, 4  ;;  %vm315_vm5 = vcmask 0   ;;  %s327_s28 = int_to_ptr.hbm [resolvable:$true] %s326_s28 }
  0x18   :  { %118 = vmatpush.msra.mxu0 %v93_v3  ;;  %342 = vmatmul.msk.f32.vlgmr.msra.gmra.mxu3 %vm99_vm0, %v199_v4  ;;  %v232_v11 = vld [vmem:[%s651_s7 + $0x10] sm:$0xff]  ;;  %v231_v12 = vld [vmem:[%s651_s7 + $0x8] sm:$0xff]  ;;  %v230_v13 = vld [vmem:[%s651_s7] sm:$0xff] }
  0x19   :  { %339 = vmatmul.msk.f32.vlgmr.msra.gmra.mxu0 %vm99_vm0, %v92_v5  ;;  %149 = vmatpush.msra.mxu1 %v126_v7  ;;  %v160_v14 = vld [vmem:[%s655_s11 + $0x18] sm:$0xff]  ;;  %v350_v15 = vld [vmem:[%s659_s15] ss:$0 sm:$0xff]  ;;  %v159_v23 = vld [vmem:[%s655_s11 + $0x10] sm:$0xff] }
  0x1a   :  { %253 = vmatpush.msrb.mxu0 %v233_v9  ;;  %180 = vmatpush.msra.mxu2 %v160_v14  ;;  %v351_v19 = vld [vmem:[%s656_s12] ss:$0 sm:$0xff]  ;;  %v158_v24 = vld [vmem:[%s655_s11 + $0x8] sm:$0xff]  ;;  %v265_v25 = vld [vmem:[%s652_s8 + $0x18] sm:$0xff] }
  0x1b   :  { %150 = vmatpush.msra.mxu1 %v125_v8  ;;  %v157_v26 = vld [vmem:[%s655_s11] sm:$0xff]  ;;  %v264_v27 = vld [vmem:[%s652_s8 + $0x10] sm:$0xff]  ;;  %285 = vmatpush.msrb.mxu3 %v265_v25  ;;  %v263_v28 = vld [vmem:[%s652_s8 + $0x8] sm:$0xff]  ;;  %v193_v53 = vstv %s670_s24 }
  0x1c   :  { %254 = vmatpush.msrb.mxu0 %v232_v11  ;;  %181 = vmatpush.msra.mxu2 %v159_v23  ;;  %v262_v29 = vld [vmem:[%s652_s8] sm:$0xff] }
  0x1d   :  { %151 = vmatpush.msra.mxu1 %v124_v10  ;;  %286 = vmatpush.msrb.mxu3 %v264_v27  ;;  %v295_v30 = vld [vmem:[%s649_s5] sm:$0xff] }
  0x1e   :  { %255 = vmatpush.msrb.mxu0 %v231_v12  ;;  %182 = vmatpush.msra.mxu2 %v158_v24  ;;  %v352_v32 = vld [vmem:[%s660_s16] ss:$0 sm:$0xff] }
  0x1f   :  { %287 = vmatpush.msrb.mxu3 %v263_v28  ;;  %297 = vperm.xlu0 %349, %v295_v30   ;;  %v353_v36 = vld [vmem:[%s657_s13] ss:$0 sm:$0xff] }
  0x20   :  { %256 = vmatpush.msrb.mxu0 %v230_v13  ;;  %183 = vmatpush.msra.mxu2 %v157_v26  ;;  %v354_v40 = vld [vmem:[%s661_s17] ss:$0 sm:$0xff] }
  0x21   :  { %288 = vmatpush.msrb.mxu3 %v262_v29  ;;  %v355_v46 = vld [vmem:[%s658_s14] ss:$0 sm:$0xff] }
  0x22   :  { %v195_v52 = vld [vmem:[%s648_s4] sm:$0xff]  ;;  %s437_s4 = smov [#allocation8]  }
  0x23   :  { %v196_v54 = vsub.f32 1.0, %v195_v52  ;;  %v192_v57 = vld [vmem:[%s671_s25] sm:$0xff]  ;;  %s324_s12 = sshll.u32 %s437_s4, 4  ;;  %s325_s12 = int_to_ptr.vmem [resolvable:$true] %s324_s12 }
  0x91   :  { %v298_v47 = vpop.permute.xlu0 %297 }
  0x92   :  { %vm299_vm3 = vcmp.eq.s32.totalorder %v294_v44, %v298_v47 }
  0x96   :  { %v120_v16 = vpop.f32.mrf.mxu0 }
  0x97   :  { %v121_v17 = vadd.f32 %v350_v15, %v120_v16 }
  0x99   :  { %v123_v18 = vmax.f32 %v121_v17, 0.0 }
  0x9b   :  { %340 = vmatmul.msk.f32.vlgmr.msra.gmra.mxu1 %vm132_vm1, %v123_v18  ;;  %v226_v20 = vpop.f32.mrf.mxu3 }
  0x9c   :  { %v227_v21 = vadd.f32 %v351_v19, %v226_v20 }
  0x9e   :  { %v229_v22 = vmax.f32 %v227_v21, 0.0 }
  0xa0   :  { %343 = vmatmul.msk.f32.vlgmr.msrb.gmra.mxu0 %vm132_vm1, %v229_v22 }
 0x118   :  { %v153_v33 = vpop.f32.mrf.mxu1 }
 0x119   :  { %v154_v34 = vadd.f32 %v352_v32, %v153_v33 }
 0x11b   :  { %v156_v35 = vmax.f32 %v154_v34, 0.0 }
 0x11d   :  { %341 = vmatmul.msk.f32.vlgmr.msra.gmra.mxu2 %vm132_vm1, %v156_v35  ;;  %v258_v37 = vpop.f32.mrf.mxu0 }
 0x11e   :  { %v259_v38 = vadd.f32 %v353_v36, %v258_v37 }
 0x120   :  { %v261_v39 = vmax.f32 %v259_v38, 0.0 }
 0x122   :  { %344 = vmatmul.msk.f32.vlgmr.msrb.gmra.mxu3 %vm132_vm1, %v261_v39 }
 0x1a0   :  { %v185_v42 = vpop.f32.mrf.mxu2 }
 0x1a1   :  { %v186_v43 = vadd.f32 %v354_v40, %v185_v42 }
 0x1a3   :  { %v189_v45 = vsel %vm188_vm2, %v186_v43, -inf }
 0x1a4   :  { %190 = vmax.xlane.f32.xlu0 %v189_v45 }
 0x1a5   :  { %v290_v48 = vpop.f32.mrf.mxu3 }
 0x1a6   :  { %v291_v49 = vadd.f32 %v355_v46, %v290_v48 }
 0x1a8   :  { %v300_v50 = vsel %vm299_vm3, %v291_v49, 0.0 }
 0x1a9   :  { %v301_v51 = vsel %vm188_vm2, %v300_v50, 0.0 }
 0x1aa   :  { %302 = vadd.xlane.f32.xlu1 %v301_v51 }
 0x217   :  { %v191_v55 = vpop.xlane.xlu0 %190 }
 0x218   :  { %v194_v56 = vmul.f32 %v193_v53, %v191_v55 }
 0x21a   :  { %v197_v58 = vmul.f32 %v196_v54, %v194_v56 }
 0x21c   :  { %v198_v59 = vadd.f32 %v197_v58, %v192_v57 }
 0x21d   :  { %v303_v60 = vpop.xlane.xlu1 %302 }
 0x21e   :  { %305 = vst.msk [vmem:[%s662_s18] sm:$0xff] %vm304_vm4, %v303_v60  ;;  %v306_v61 = vsub.f32 %v198_v59, %v303_v60 }
 0x220   :  { %v307_v62 = vmul.f32 %v306_v61, %v306_v61 }
 0x222   :  { %v308_v63 = vsel %vm304_vm4, %v307_v62, 0.0 }
 0x223   :  { %v309_v0 = vrot.slane %v308_v63, 4 }
 0x225   :  { %v310_v1 = vadd.f32 %v309_v0, %v308_v63 }
 0x227   :  { %v311_v2 = vrot.slane %v310_v1, 2 }
 0x229   :  { %v312_v3 = vadd.f32 %v311_v2, %v310_v1 }
 0x22b   :  { %v313_v4 = vrot.slane %v312_v3, 1 }
 0x22d   :  { %v314_v5 = vadd.f32 %v313_v4, %v312_v3 }
 0x22f   :  { %316 = vst.msk [vmem:[#allocation8] sm:$0x1] %vm315_vm5, %v314_v5 }
 0x230   :  { %329 = dma.vmem_to_hbm [thread:$0]  %s325_s12, 16, %s327_s28, [#allocation5]  }
 0x231   :  { %432 = dma.done.wait [#allocation5], 16  }
 0x232   :  { %433 = vsyncadd [#allocation5], 4294967280 }
 0x233   :  { %336 = vsyncpa [#allocation4], 1 }
 0x234   :  { %337 = vsyncpa [#allocation7], 1 }
 0x235   :  { %338 = vsyncpa [#allocation5], 1 }

// kernel: tpu_custom_call.1
= control target key start
LH: loop header
LB: loop body
LE: loop exit
PB: predicated region body
PF: predicated region fallthrough
CT: control target
= control target key end

     0   :  { %s644_s0 = inlined_call_operand.<no memory space> [shape: f32[1,1], index: 0, kind: input, shape index: {}]   ;;  %s645_s1 = inlined_call_operand.hbm [shape: f32[8,16], index: 1, kind: input, shape index: {}]   ;;  %s646_s2 = inlined_call_operand.hbm [shape: f32[8,16], index: 2, kind: input, shape index: {}]   ;;  %s647_s3 = inlined_call_operand.vmem [shape: f32[8,1], index: 3, kind: input, shape index: {}]   ;;  %s648_s4 = inlined_call_operand.vmem [shape: f32[8,1], index: 4, kind: input, shape index: {}]   ;;  %s649_s5 = inlined_call_operand.vmem [shape: s32[8,1], index: 5, kind: input, shape index: {}]   ;;  %s650_s6 = inlined_call_operand.vmem [shape: f32[16,32], index: 6, kind: input, shape index: {}]   ;;  %s651_s7 = inlined_call_operand.vmem [shape: f32[32,32], index: 7, kind: input, shape index: {}]   ;;  %s652_s8 = inlined_call_operand.vmem [shape: f32[32,4], index: 8, kind: input, shape index: {}]   ;;  %s653_s9 = inlined_call_operand.vmem [shape: f32[16,32], index: 9, kind: input, shape index: {}]   ;;  %s654_s10 = inlined_call_operand.vmem [shape: f32[32,32], index: 10, kind: input, shape index: {}]   ;;  %s655_s11 = inlined_call_operand.vmem [shape: f32[32,4], index: 11, kind: input, shape index: {}]   ;;  %s656_s12 = inlined_call_operand.vmem [shape: f32[1,32], index: 12, kind: input, shape index: {}]   ;;  %s657_s13 = inlined_call_operand.vmem [shape: f32[1,32], index: 13, kind: input, shape index: {}]   ;;  %s658_s14 = inlined_call_operand.vmem [shape: f32[1,4], index: 14, kind: input, shape index: {}]   ;;  %s659_s15 = inlined_call_operand.vmem [shape: f32[1,32], index: 15, kind: input, shape index: {}]   ;;  %s660_s16 = inlined_call_operand.vmem [shape: f32[1,32], index: 16, kind: input, shape index: {}]   ;;  %s661_s17 = inlined_call_operand.vmem [shape: f32[1,4], index: 17, kind: input, shape index: {}]   ;;  %s662_s18 = inlined_call_operand.vmem [shape: f32[8,1], index: 18, kind: output, shape index: {0}]   ;;  %s663_s19 = inlined_call_operand.hbm [shape: f32[1,1,1], index: 19, kind: output, shape index: {1}]  }
   0x1   :  { %664 = sst [smem:[#allocation12_spill]] %s644_s0 }
   0x2   :  { %665 = sst [smem:[#allocation13_spill]] %s645_s1 }
   0x3   :  { %666 = sst [smem:[#allocation14_spill]] %s646_s2 }
   0x4   :  { %667 = sst [smem:[#allocation15_spill]] %s647_s3 }
   0x5   :  { %26 = vsyncpa [#allocation4], 0 }
   0x6   :  { %27 = vsyncpa [#allocation7], 0 }
   0x7   :  { %28 = vsyncpa [#allocation5], 0  ;;  %s668_s20 = sld [smem:[#allocation13_spill]]  ;;  %s434_s1 = smov [#allocation3]  }
   0x8   :  { %s38_s22 = sshll.u32 %s434_s1, 4  ;;  %s669_s24 = sld [smem:[#allocation14_spill]]  ;;  %s39_s22 = int_to_ptr.vmem [resolvable:$true] %s38_s22 }
   0x9   :  { %s435_s3 = smov [#allocation6]  }
   0xa   :  { %s49_s26 = sshll.u32 %s435_s3, 4  ;;  %s50_s26 = int_to_ptr.vmem [resolvable:$true] %s49_s26 }
   0xd   :  { %s36_s21 = sshll.u32 %s668_s20, 4  ;;  %s37_s21 = int_to_ptr.hbm [resolvable:$true] %s36_s21 }
   0xe   :  { %s47_s25 = sshll.u32 %s669_s24, 4  ;;  %s48_s25 = int_to_ptr.hbm [resolvable:$true] %s47_s25 }
   0xf   :  { %41 = dma.hbm_to_vmem [thread:$0]  %s37_s21, 128, %s39_s22, [#allocation4]  }
  0x10   :  { %52 = dma.hbm_to_vmem [thread:$0]  %s48_s25, 128, %s50_s26, [#allocation7]  }
  0x11   :  { %428 = dma.done.wait [#allocation4], 128  }
  0x12   :  { %429 = vsyncadd [#allocation4], 4294967168 }
  0x13   :  { %430 = dma.done.wait [#allocation7], 128  }
  0x14   :  { %431 = vsyncadd [#allocation7], 4294967168  ;;  %v201_v0 = vld [vmem:[%s650_s6 + $0x8] sm:$0xff]  ;;  %v200_v2 = vld [vmem:[%s650_s6] sm:$0xff]  ;;  %vm99_vm0 = vcmask 130048   ;;  %vm132_vm1 = vcmask 261120   ;;  %v293_v41 = vlaneseq }
  0x15   :  { %v94_v1 = vld [vmem:[%s653_s9 + $0x8] sm:$0xff]  ;;  %223 = vmatpush.msra.mxu3 %v201_v0  ;;  %v93_v3 = vld [vmem:[%s653_s9] sm:$0xff]  ;;  %v127_v6 = vld [vmem:[%s654_s10 + $0x18] sm:$0xff]  ;;  %v436_v31 = vmov 0   ;;  %vm188_vm2 = vcmask 31744   ;;  %s670_s24 = sld [smem:[#allocation12_spill]] }
  0x16   :  { %117 = vmatpush.msra.mxu0 %v94_v1  ;;  %v199_v4 = vld [vmem:[#allocation3] sm:$0xff]  ;;  %v92_v5 = vld [vmem:[#allocation6] sm:$0xff]  ;;  %148 = vmatpush.msra.mxu1 %v127_v6  ;;  %v126_v7 = vld [vmem:[%s654_s10 + $0x10] sm:$0xff]  ;;  %v294_v44 = vand.u32 127, %v293_v41  ;;  %s671_s25 = sld [smem:[#allocation15_spill]]  ;;  %vm304_vm4 = vcmask 7168  }
  0x17   :  { %224 = vmatpush.msra.mxu3 %v200_v2  ;;  %v125_v8 = vld [vmem:[%s654_s10 + $0x8] sm:$0xff]  ;;  %v233_v9 = vld [vmem:[%s651_s7 + $0x18] sm:$0xff]  ;;  %v124_v10 = vld [vmem:[%s654_s10] sm:$0xff]  ;;  %349 = vset.pattern.permute.xlu0 %v436_v31  ;;  %s326_s28 = sshll.u32 %s663_s19, 4  ;;  %vm315_vm5 = vcmask 0   ;;  %s327_s28 = int_to_ptr.hbm [resolvable:$true] %s326_s28 }
  0x18   :  { %118 = vmatpush.msra.mxu0 %v93_v3  ;;  %342 = vmatmul.msk.f32.vlgmr.msra.gmra.mxu3 %vm99_vm0, %v199_v4  ;;  %v232_v11 = vld [vmem:[%s651_s7 + $0x10] sm:$0xff]  ;;  %v231_v12 = vld [vmem:[%s651_s7 + $0x8] sm:$0xff]  ;;  %v230_v13 = vld [vmem:[%s651_s7] sm:$0xff] }
  0x19   :  { %339 = vmatmul.msk.f32.vlgmr.msra.gmra.mxu0 %vm99_vm0, %v92_v5  ;;  %149 = vmatpush.msra.mxu1 %v126_v7  ;;  %v160_v14 = vld [vmem:[%s655_s11 + $0x18] sm:$0xff]  ;;  %v350_v15 = vld [vmem:[%s659_s15] ss:$0 sm:$0xff]  ;;  %v159_v23 = vld [vmem:[%s655_s11 + $0x10] sm:$0xff] }
  0x1a   :  { %253 = vmatpush.msrb.mxu0 %v233_v9  ;;  %180 = vmatpush.msra.mxu2 %v160_v14  ;;  %v351_v19 = vld [vmem:[%s656_s12] ss:$0 sm:$0xff]  ;;  %v158_v24 = vld [vmem:[%s655_s11 + $0x8] sm:$0xff]  ;;  %v265_v25 = vld [vmem:[%s652_s8 + $0x18] sm:$0xff] }
  0x1b   :  { %150 = vmatpush.msra.mxu1 %v125_v8  ;;  %v157_v26 = vld [vmem:[%s655_s11] sm:$0xff]  ;;  %v264_v27 = vld [vmem:[%s652_s8 + $0x10] sm:$0xff]  ;;  %285 = vmatpush.msrb.mxu3 %v265_v25  ;;  %v263_v28 = vld [vmem:[%s652_s8 + $0x8] sm:$0xff]  ;;  %v193_v53 = vstv %s670_s24 }
  0x1c   :  { %254 = vmatpush.msrb.mxu0 %v232_v11  ;;  %181 = vmatpush.msra.mxu2 %v159_v23  ;;  %v262_v29 = vld [vmem:[%s652_s8] sm:$0xff] }
  0x1d   :  { %151 = vmatpush.msra.mxu1 %v124_v10  ;;  %286 = vmatpush.msrb.mxu3 %v264_v27  ;;  %v295_v30 = vld [vmem:[%s649_s5] sm:$0xff] }
  0x1e   :  { %255 = vmatpush.msrb.mxu0 %v231_v12  ;;  %182 = vmatpush.msra.mxu2 %v158_v24  ;;  %v352_v32 = vld [vmem:[%s660_s16] ss:$0 sm:$0xff] }
  0x1f   :  { %287 = vmatpush.msrb.mxu3 %v263_v28  ;;  %297 = vperm.xlu0 %349, %v295_v30   ;;  %v353_v36 = vld [vmem:[%s657_s13] ss:$0 sm:$0xff] }
  0x20   :  { %256 = vmatpush.msrb.mxu0 %v230_v13  ;;  %183 = vmatpush.msra.mxu2 %v157_v26  ;;  %v354_v40 = vld [vmem:[%s661_s17] ss:$0 sm:$0xff] }
  0x21   :  { %288 = vmatpush.msrb.mxu3 %v262_v29  ;;  %v355_v46 = vld [vmem:[%s658_s14] ss:$0 sm:$0xff] }
  0x22   :  { %v195_v52 = vld [vmem:[%s648_s4] sm:$0xff]  ;;  %s437_s4 = smov [#allocation8]  }
  0x23   :  { %v196_v54 = vsub.f32 1.0, %v195_v52  ;;  %v192_v57 = vld [vmem:[%s671_s25] sm:$0xff]  ;;  %s324_s12 = sshll.u32 %s437_s4, 4  ;;  %s325_s12 = int_to_ptr.vmem [resolvable:$true] %s324_s12 }
  0x91   :  { %v298_v47 = vpop.permute.xlu0 %297 }
  0x92   :  { %vm299_vm3 = vcmp.eq.s32.totalorder %v294_v44, %v298_v47 }
  0x96   :  { %v120_v16 = vpop.f32.mrf.mxu0 }
  0x97   :  { %v121_v17 = vadd.f32 %v350_v15, %v120_v16 }
  0x99   :  { %v123_v18 = vmax.f32 %v121_v17, 0.0 }
  0x9b   :  { %340 = vmatmul.msk.f32.vlgmr.msra.gmra.mxu1 %vm132_vm1, %v123_v18  ;;  %v226_v20 = vpop.f32.mrf.mxu3 }
  0x9c   :  { %v227_v21 = vadd.f32 %v351_v19, %v226_v20 }
  0x9e   :  { %v229_v22 = vmax.f32 %v227_v21, 0.0 }
  0xa0   :  { %343 = vmatmul.msk.f32.vlgmr.msrb.gmra.mxu0 %vm132_vm1, %v229_v22 }
 0x118   :  { %v153_v33 = vpop.f32.mrf.mxu1 }
 0x119   :  { %v154_v34 = vadd.f32 %v352_v32, %v153_v33 }
 0x11b   :  { %v156_v35 = vmax.f32 %v154_v34, 0.0 }
 0x11d   :  { %341 = vmatmul.msk.f32.vlgmr.msra.gmra.mxu2 %vm132_vm1, %v156_v35  ;;  %v258_v37 = vpop.f32.mrf.mxu0 }
 0x11e   :  { %v259_v38 = vadd.f32 %v353_v36, %v258_v37 }
 0x120   :  { %v261_v39 = vmax.f32 %v259_v38, 0.0 }
 0x122   :  { %344 = vmatmul.msk.f32.vlgmr.msrb.gmra.mxu3 %vm132_vm1, %v261_v39 }
 0x1a0   :  { %v185_v42 = vpop.f32.mrf.mxu2 }
 0x1a1   :  { %v186_v43 = vadd.f32 %v354_v40, %v185_v42 }
 0x1a3   :  { %v189_v45 = vsel %vm188_vm2, %v186_v43, -inf }
 0x1a4   :  { %190 = vmax.xlane.f32.xlu0 %v189_v45 }
 0x1a5   :  { %v290_v48 = vpop.f32.mrf.mxu3 }
 0x1a6   :  { %v291_v49 = vadd.f32 %v355_v46, %v290_v48 }
 0x1a8   :  { %v300_v50 = vsel %vm299_vm3, %v291_v49, 0.0 }
 0x1a9   :  { %v301_v51 = vsel %vm188_vm2, %v300_v50, 0.0 }
 0x1aa   :  { %302 = vadd.xlane.f32.xlu1 %v301_v51 }
 0x217   :  { %v191_v55 = vpop.xlane.xlu0 %190 }
 0x218   :  { %v194_v56 = vmul.f32 %v193_v53, %v191_v55 }
 0x21a   :  { %v197_v58 = vmul.f32 %v196_v54, %v194_v56 }
 0x21c   :  { %v198_v59 = vadd.f32 %v197_v58, %v192_v57 }
 0x21d   :  { %v303_v60 = vpop.xlane.xlu1 %302 }
 0x21e   :  { %305 = vst.msk [vmem:[%s662_s18] sm:$0xff] %vm304_vm4, %v303_v60  ;;  %v306_v61 = vsub.f32 %v198_v59, %v303_v60 }
 0x220   :  { %v307_v62 = vmul.f32 %v306_v61, %v306_v61 }
 0x222   :  { %v308_v63 = vsel %vm304_vm4, %v307_v62, 0.0 }
 0x223   :  { %v309_v0 = vrot.slane %v308_v63, 4 }
 0x225   :  { %v310_v1 = vadd.f32 %v309_v0, %v308_v63 }
 0x227   :  { %v311_v2 = vrot.slane %v310_v1, 2 }
 0x229   :  { %v312_v3 = vadd.f32 %v311_v2, %v310_v1 }
 0x22b   :  { %v313_v4 = vrot.slane %v312_v3, 1 }
 0x22d   :  { %v314_v5 = vadd.f32 %v313_v4, %v312_v3 }
 0x22f   :  { %316 = vst.msk [vmem:[#allocation8] sm:$0x1] %vm315_vm5, %v314_v5 }
 0x230   :  { %329 = dma.vmem_to_hbm [thread:$0]  %s325_s12, 16, %s327_s28, [#allocation5]  }
 0x231   :  { %432 = dma.done.wait [#allocation5], 16  }
 0x232   :  { %433 = vsyncadd [#allocation5], 4294967280 }
 0x233   :  { %336 = vsyncpa [#allocation4], 1 }
 0x234   :  { %337 = vsyncpa [#allocation7], 1 }
 0x235   :  { %338 = vsyncpa [#allocation5], 1 }

</bundles_post_ra>
